<compile_context>
chip_gen: v7x
topology: tpu7x:2x2x1
jax: 0.10.0
libtpu: 0.0.40
codegen_flags: <defaults>
</compile_context>

<pallas_src>
import functools

import jax
import jax.numpy as jnp
from jax.experimental import pallas as pl
from jax.experimental.pallas import tpu as pltpu


def _round_up(x, m):
    return ((x + m - 1) // m) * m


def _cdiv(a, b):
    return -(-a // b)


def _vmem_capacity_bytes():
    """Per-TensorCore VMEM: 128 MiB on v5e/v6e/v5p, 64 MiB on v7x (conservative default)."""
    try:
        kind = jax.devices()[0].device_kind.lower()
    except Exception:
        kind = ""
    if "v5" in kind or "v6" in kind:
        return 128 * 1024 * 1024
    return 64 * 1024 * 1024


def _pick_divisor_tI(I, tI_max, even_chunks):
    """Largest multiple of 128 that divides I and is <= tI_max (optionally with an
    even number of chunks, so the v7x two-core split needs no padding)."""
    start = (min(tI_max, I) // 128) * 128
    for d in range(start, 127, -128):
        if I % d == 0 and (not even_chunks or (I // d) % 2 == 0):
            return d
    return None


def _choose_tiles(T, H, I, cap, tm_req=None, tI_req=None):
    big_vmem = cap >= 96 * 1024 * 1024            # v5e/v6e vs v7x
    vmem_limit = int(cap * 0.82)                  # ~105 MiB on 128 MiB parts, ~52 MiB on v7x

    # --- token tile ---------------------------------------------------------
    tm = tm_req if tm_req is not None else (512 if big_vmem else 256)
    tm = max(16, min(_round_up(tm, 16), _round_up(T, 16)))
    # don't let the tm-side footprint (x/out/acc tiles) eat the weight budget on huge H
    while tm > 16 and 16 * tm * H > vmem_limit // 3:
        tm //= 2
    tm = _round_up(tm, 16)
    nT = _cdiv(T, tm)
    Tp = nT * tm

    # --- intermediate-dim chunk from VMEM budget ----------------------------
    fixed = 16 * tm * H                           # x dbuf (4B) + out dbuf (<=8B) + f32 acc (4B)
    headroom = 6 * 1024 * 1024                    # compiler-internal scratch, misc temps
    weight_budget = max(vmem_limit - fixed - headroom, 12 * H * 128)
    # per unit of tI: wg/wu/wd double-buffered bf16 (12*H) + gate/up/hidden temps (~12*tm)
    tI_max = max(128, (weight_budget // (12 * H + 12 * tm)) // 128 * 128)
    if tI_req is not None:
        tI_max = min(tI_max, max(128, _round_up(tI_req, 128)))
    tI_max = min(tI_max, _round_up(I, 128))

    # --- v7x decode: split the reduction across both TensorCores ------------
    want_split = (not big_vmem) and nT == 1 and I >= 256
    tI = _pick_divisor_tI(I, tI_max, even_chunks=True) if want_split else None
    n_split = 2 if tI is not None else 1
    if tI is None:
        tI = _pick_divisor_tI(I, tI_max, even_chunks=False)
    if tI is None:
        tI = tI_max                               # no usable divisor: fall back to zero-padding

    nI_per = _cdiv(_cdiv(I, tI), n_split)
    Ip = n_split * nI_per * tI
    return tm, tI, n_split, nI_per, nT, Tp, Ip, vmem_limit


def _mlp_kernel(x_ref, wg_ref, wu_ref, wd_ref, o_ref, acc_ref):
    # x_ref  : (tm, H)   bf16  activation tile (resident across the k axis)
    # wg_ref : (H, tI)   bf16  gate_proj weight chunk
    # wu_ref : (H, tI)   bf16  up_proj weight chunk
    # wd_ref : (tI, H)   bf16  down_proj weight chunk
    # o_ref  : (tm, H)         output (partial) tile — leading split dim squeezed
    # acc_ref: (tm, H)   f32   accumulator scratch
    k = pl.program_id(2)

    x = x_ref[...]
    g = jnp.dot(x, wg_ref[...], preferred_element_type=jnp.float32)
    u = jnp.dot(x, wu_ref[...], preferred_element_type=jnp.float32)
    # SiLU + gating in f32 (VPU/EUP); bf16 only for the down_proj MXU pass.
    hidden = (g * jax.nn.sigmoid(g) * u).astype(wd_ref.dtype)
    partial = jnp.dot(hidden, wd_ref[...], preferred_element_type=jnp.float32)

    @pl.when(k == 0)
    def _():
        acc_ref[...] = partial           # direct store: no zero-init pass

    @pl.when(k > 0)
    def _():
        acc_ref[...] += partial

    @pl.when(k == pl.num_programs(2) - 1)
    def _():
        o_ref[...] = acc_ref[...].astype(o_ref.dtype)


def qwen2_mlp(x, wg, wu, wd, *, tm=None, tI=None):
    """SwiGLU MLP: down_proj(silu(gate_proj(x)) * up_proj(x)).

    x  : (..., H)
    wg : (H, I)   gate_proj.weight.T
    wu : (H, I)   up_proj.weight.T
    wd : (I, H)   down_proj.weight.T
    Returns an array of the same shape/dtype as x.
    """
    orig_shape = x.shape
    H = orig_shape[-1]
    I = wg.shape[1]
    out_dtype = x.dtype

    x2 = x.reshape(-1, H)
    T = x2.shape[0]

    cap = _vmem_capacity_bytes()
    tm_eff, tI_eff, n_split, nI_per, nT, Tp, Ip, vmem_limit = _choose_tiles(
        T, H, I, cap, tm_req=tm, tI_req=tI)

    if Tp != T:
        x2 = jnp.pad(x2, ((0, Tp - T), (0, 0)))
    if Ip != I:
        # Exact: silu(0)*up = 0 and zero down_proj rows add 0.  Divisor-based tI
        # normally avoids this path for real Qwen2 sizes.
        # TODO(synk): for production, pre-pad/pre-format weights once outside the forward.
        wg = jnp.pad(wg, ((0, 0), (0, Ip - I)))
        wu = jnp.pad(wu, ((0, 0), (0, Ip - I)))
        wd = jnp.pad(wd, ((0, Ip - I), (0, 0)))

    # bf16 MXU inputs, f32 accumulation inside the kernel (no-op if already bf16).
    x2 = x2.astype(jnp.bfloat16)
    wg = wg.astype(jnp.bfloat16)
    wu = wu.astype(jnp.bfloat16)
    wd = wd.astype(jnp.bfloat16)

    partial_dtype = jnp.float32 if n_split > 1 else out_dtype

    flops = 2 * Tp * H * (3 * Ip)
    bytes_accessed = (
        6 * H * Ip * nT                                           # bf16 weights, re-streamed per token tile
        + Tp * H * 2                                              # x in (bf16)
        + n_split * Tp * H * jnp.dtype(partial_dtype).itemsize    # output / partials
    )
    cost = pl.CostEstimate(flops=int(flops), transcendentals=int(Tp * Ip),
                           bytes_accessed=int(bytes_accessed))

    out = pl.pallas_call(
        _mlp_kernel,
        out_shape=jax.ShapeDtypeStruct((n_split, Tp, H), partial_dtype),
        grid_spec=pltpu.PrefetchScalarGridSpec(
            num_scalar_prefetch=0,
            # split (parallel, v7x 2-TC decode) x token tiles (parallel) x I chunks (reduction, last)
            grid=(n_split, nT, nI_per),
            in_specs=[
                pl.BlockSpec((tm_eff, H), lambda s, i, k: (i, 0)),                  # x: k/s-invariant, stays resident
                pl.BlockSpec((H, tI_eff), lambda s, i, k: (0, s * nI_per + k)),     # gate_proj chunk
                pl.BlockSpec((H, tI_eff), lambda s, i, k: (0, s * nI_per + k)),     # up_proj chunk
                pl.BlockSpec((tI_eff, H), lambda s, i, k: (s * nI_per + k, 0)),     # down_proj chunk
            ],
            out_specs=pl.BlockSpec((None, tm_eff, H), lambda s, i, k: (s, i, 0)),
            scratch_shapes=[pltpu.VMEM((tm_eff, H), jnp.float32)],
        ),
        compiler_params=pltpu.CompilerParams(
            dimension_semantics=("parallel", "parallel", "arbitrary"),
            vmem_limit_bytes=vmem_limit,
        ),
        cost_estimate=cost,
    )(x2, wg, wu, wd)

    if n_split > 1:
        out = out.sum(axis=0).astype(out_dtype)     # tiny follow-up combine of the 2 TC partials
    else:
        out = out[0]
    if Tp != T:
        out = out[:T]
    return out.reshape(orig_shape)


def reference_mlp(x, wg, wu, wd):
    """bf16-precision-matched reference (mirrors the kernel's numerics)."""
    xb = x.astype(jnp.bfloat16)
    g = jnp.dot(xb, wg.astype(jnp.bfloat16), preferred_element_type=jnp.float32)
    u = jnp.dot(xb, wu.astype(jnp.bfloat16), preferred_element_type=jnp.float32)
    h = (g * jax.nn.sigmoid(g) * u).astype(jnp.bfloat16)
    o = jnp.dot(h, wd.astype(jnp.bfloat16), preferred_element_type=jnp.float32)
    return o.astype(x.dtype)


if __name__ == "__main__":
    # Small config consistent with Qwen2MLP: hidden_size=128, intermediate_size=256.
    batch, seq, hidden, inter = 2, 8, 128, 256

    key = jax.random.PRNGKey(0)
    kx, kg, ku, kd = jax.random.split(key, 4)

    x = jax.random.normal(kx, (batch, seq, hidden), dtype=jnp.float32)
    # nn.Linear weights (bias=False), stored pre-transposed for the kernel.
    wg = jax.random.normal(kg, (hidden, inter), dtype=jnp.float32) * (hidden ** -0.5)
    wu = jax.random.normal(ku, (hidden, inter), dtype=jnp.float32) * (hidden ** -0.5)
    wd = jax.random.normal(kd, (inter, hidden), dtype=jnp.float32) * (inter ** -0.5)

    out = qwen2_mlp(x, wg, wu, wd)
    out = jax.block_until_ready(out)

    ref = reference_mlp(x.reshape(-1, hidden), wg, wu, wd).reshape(batch, seq, hidden)
    assert out.shape == (batch, seq, hidden)
    assert jnp.allclose(out, ref, atol=2e-2, rtol=2e-2), float(jnp.max(jnp.abs(out - ref)))

    print("KERNEL_OK")
</pallas_src>

<mosaic_0001>
module attributes {stable_mosaic.version = 11 : i64} {
  func.func @_mlp_kernel(%arg0: i32, %arg1: i32, %arg2: i32, %arg3: memref<16x128xbf16, #tpu.memory_space<vmem>>, %arg4: memref<128x128xbf16, #tpu.memory_space<vmem>>, %arg5: memref<128x128xbf16, #tpu.memory_space<vmem>>, %arg6: memref<128x128xbf16, #tpu.memory_space<vmem>>, %arg7: memref<1x16x128xf32, #tpu.memory_space<vmem>>, %arg8: memref<16x128xf32, #tpu.memory_space<vmem>>) attributes {dimension_semantics = [#tpu.dimension_semantics<parallel>, #tpu.dimension_semantics<parallel>, #tpu.dimension_semantics<arbitrary>], iteration_bounds = array<i64: 2, 1, 1>, scalar_prefetch = 0 : i64, scratch_operands = 1 : i64, tpu.core_type = #tpu.core_type<tc>, window_params = [{transform_indices = @transform_0, window_bounds = array<i64: 16, 128>}, {transform_indices = @transform_1, window_bounds = array<i64: 128, 128>}, {transform_indices = @transform_2, window_bounds = array<i64: 128, 128>}, {transform_indices = @transform_3, window_bounds = array<i64: 128, 128>}, {transform_indices = @transform_4, window_bounds = array<i64: 1, 16, 128>}]} {
    %c0 = arith.constant 0 : index
    %c0_0 = arith.constant 0 : index
    %0 = vector.load %arg3[%c0, %c0_0] : memref<16x128xbf16, #tpu.memory_space<vmem>>, vector<16x128xbf16>
    %c0_1 = arith.constant 0 : index
    %c0_2 = arith.constant 0 : index
    %1 = vector.load %arg4[%c0_1, %c0_2] : memref<128x128xbf16, #tpu.memory_space<vmem>>, vector<128x128xbf16>
    %cst = arith.constant dense<0.000000e+00> : vector<16x128xf32>
    %2 = tpu.matmul %0, %1, %cst {dimension_numbers = #tpu.dot_dimension_numbers<[1], [0], [0], [1], [0, 0, 1, 1], [], []>} : vector<16x128xbf16>, vector<128x128xbf16>, vector<16x128xf32> -> vector<16x128xf32>
    %c0_3 = arith.constant 0 : index
    %c0_4 = arith.constant 0 : index
    %3 = vector.load %arg5[%c0_3, %c0_4] : memref<128x128xbf16, #tpu.memory_space<vmem>>, vector<128x128xbf16>
    %cst_5 = arith.constant dense<0.000000e+00> : vector<16x128xf32>
    %4 = tpu.matmul %0, %3, %cst_5 {dimension_numbers = #tpu.dot_dimension_numbers<[1], [0], [0], [1], [0, 0, 1, 1], [], []>} : vector<16x128xbf16>, vector<128x128xbf16>, vector<16x128xf32> -> vector<16x128xf32>
    %5 = arith.negf %2 : vector<16x128xf32>
    %6 = math.exp %5 : vector<16x128xf32>
    %cst_6 = arith.constant 1.000000e+00 : f32
    %7 = vector.broadcast %cst_6 : f32 to vector<16x128xf32>
    %8 = arith.addf %7, %6 : vector<16x128xf32>
    %9 = arith.divf %7, %8 : vector<16x128xf32>
    %10 = arith.mulf %2, %9 : vector<16x128xf32>
    %11 = arith.mulf %10, %4 : vector<16x128xf32>
    %12 = arith.truncf %11 : vector<16x128xf32> to vector<16x128xbf16>
    %c0_7 = arith.constant 0 : index
    %c0_8 = arith.constant 0 : index
    %13 = vector.load %arg6[%c0_7, %c0_8] : memref<128x128xbf16, #tpu.memory_space<vmem>>, vector<128x128xbf16>
    %cst_9 = arith.constant dense<0.000000e+00> : vector<16x128xf32>
    %14 = tpu.matmul %12, %13, %cst_9 {dimension_numbers = #tpu.dot_dimension_numbers<[1], [0], [0], [1], [0, 0, 1, 1], [], []>} : vector<16x128xbf16>, vector<128x128xbf16>, vector<16x128xf32> -> vector<16x128xf32>
    %c0_i32 = arith.constant 0 : i32
    %15 = arith.cmpi eq, %arg2, %c0_i32 : i32
    %16 = arith.extui %15 : i1 to i32
    %c0_i32_10 = arith.constant 0 : i32
    %17 = arith.cmpi ne, %16, %c0_i32_10 : i32
    scf.if %17 {
      %c0_15 = arith.constant 0 : index
      %c0_16 = arith.constant 0 : index
      %24 = vector.load %arg8[%c0_15, %c0_16] : memref<16x128xf32, #tpu.memory_space<vmem>>, vector<16x128xf32>
      tpu.vector_store %arg8[%c0_15, %c0_16], %14 {strides = array<i32>} : memref<16x128xf32, #tpu.memory_space<vmem>>, vector<16x128xf32>,
    } else {
    }
    %c0_i32_11 = arith.constant 0 : i32
    %18 = arith.cmpi sgt, %arg2, %c0_i32_11 : i32
    %19 = arith.extui %18 : i1 to i32
    %c0_i32_12 = arith.constant 0 : i32
    %20 = arith.cmpi ne, %19, %c0_i32_12 : i32
    scf.if %20 {
      %c0_15 = arith.constant 0 : index
      %c0_16 = arith.constant 0 : index
      %24 = vector.load %arg8[%c0_15, %c0_16] : memref<16x128xf32, #tpu.memory_space<vmem>>, vector<16x128xf32>
      %25 = arith.addf %24, %14 : vector<16x128xf32>
      %c0_17 = arith.constant 0 : index
      %c0_18 = arith.constant 0 : index
      %26 = vector.load %arg8[%c0_17, %c0_18] : memref<16x128xf32, #tpu.memory_space<vmem>>, vector<16x128xf32>
      tpu.vector_store %arg8[%c0_17, %c0_18], %25 {strides = array<i32>} : memref<16x128xf32, #tpu.memory_space<vmem>>, vector<16x128xf32>,
    } else {
    }
    %c0_i32_13 = arith.constant 0 : i32
    %21 = arith.cmpi eq, %arg2, %c0_i32_13 : i32
    %22 = arith.extui %21 : i1 to i32
    %c0_i32_14 = arith.constant 0 : i32
    %23 = arith.cmpi ne, %22, %c0_i32_14 : i32
    scf.if %23 {
      %c0_15 = arith.constant 0 : index
      %c0_16 = arith.constant 0 : index
      %24 = vector.load %arg8[%c0_15, %c0_16] : memref<16x128xf32, #tpu.memory_space<vmem>>, vector<16x128xf32>
      %c0_17 = arith.constant 0 : index
      %c0_18 = arith.constant 0 : index
      %c0_19 = arith.constant 0 : index
      %25 = vector.load %arg7[%c0_17, %c0_18, %c0_19] : memref<1x16x128xf32, #tpu.memory_space<vmem>>, vector<1x16x128xf32>
      %26 = vector.shape_cast %25 : vector<1x16x128xf32> to vector<16x128xf32>
      %27 = vector.shape_cast %24 : vector<16x128xf32> to vector<1x16x128xf32>
      tpu.vector_store %arg7[%c0_17, %c0_18, %c0_19], %27 {strides = array<i32>} : memref<1x16x128xf32, #tpu.memory_space<vmem>>, vector<1x16x128xf32>,
    } else {
    }
    return
  }
  func.func @transform_0(%arg0: i32, %arg1: i32, %arg2: i32) -> (i32, i32) {
    %c0_i32 = arith.constant 0 : i32
    %c0_i32_0 = arith.constant 0 : i32
    return %arg1, %c0_i32 : i32, i32
  }
  func.func @transform_1(%arg0: i32, %arg1: i32, %arg2: i32) -> (i32, i32) {
    %c1_i32 = arith.constant 1 : i32
    %0 = arith.muli %arg0, %c1_i32 : i32
    %1 = arith.addi %0, %arg2 : i32
    %c0_i32 = arith.constant 0 : i32
    %c0_i32_0 = arith.constant 0 : i32
    return %c0_i32, %1 : i32, i32
  }
  func.func @transform_2(%arg0: i32, %arg1: i32, %arg2: i32) -> (i32, i32) {
    %c1_i32 = arith.constant 1 : i32
    %0 = arith.muli %arg0, %c1_i32 : i32
    %1 = arith.addi %0, %arg2 : i32
    %c0_i32 = arith.constant 0 : i32
    %c0_i32_0 = arith.constant 0 : i32
    return %c0_i32, %1 : i32, i32
  }
  func.func @transform_3(%arg0: i32, %arg1: i32, %arg2: i32) -> (i32, i32) {
    %c1_i32 = arith.constant 1 : i32
    %0 = arith.muli %arg0, %c1_i32 : i32
    %1 = arith.addi %0, %arg2 : i32
    %c0_i32 = arith.constant 0 : i32
    %c0_i32_0 = arith.constant 0 : i32
    return %1, %c0_i32 : i32, i32
  }
  func.func @transform_4(%arg0: i32, %arg1: i32, %arg2: i32) -> (i32, i32, i32) {
    %c0_i32 = arith.constant 0 : i32
    %c0_i32_0 = arith.constant 0 : i32
    return %arg0, %arg1, %c0_i32 : i32, i32, i32
  }
}

</mosaic_0001>

<bundles_post_ra>
// kernel: tpu_custom_call.1
= control target key start
LH: loop header
LB: loop body
LE: loop exit
PB: predicated region body
PF: predicated region fallthrough
CT: control target
= control target key end

     0   :  { %s1763_s0 = inlined_call_operand.hbm [shape: bf16[16,128], index: 0, kind: input, shape index: {}]   ;;  %s1764_s1 = inlined_call_operand.hbm [shape: bf16[128,256], index: 1, kind: input, shape index: {}]   ;;  %s1765_s2 = inlined_call_operand.hbm [shape: bf16[128,256], index: 2, kind: input, shape index: {}]   ;;  %s1766_s3 = inlined_call_operand.hbm [shape: bf16[256,128], index: 3, kind: input, shape index: {}]   ;;  %s1767_s4 = inlined_call_operand.hbm [shape: f32[2,16,128], index: 4, kind: output, shape index: {}]  }
   0x1   :  { %1787 = sst [smem:[#allocation20_spill]] %s1764_s1 }
   0x2   :  { %1788 = sst [smem:[#allocation21_spill]] %s1765_s2 }
   0x3   :  { %9 = vsyncpa [#allocation4], 0 }
   0x4   :  { %10 = vsyncpa [#allocation7], 0 }
   0x5   :  { %12 = vsyncpa [#allocation7 + $0x1], 0 }
   0x6   :  { %13 = vsyncpa [#allocation10], 0 }
   0x7   :  { %15 = vsyncpa [#allocation10 + $0x1], 0 }
   0x8   :  { %16 = vsyncpa [#allocation5], 0 }
   0x9   :  { %18 = vsyncpa [#allocation5 + $0x1], 0  ;;  %s1386_s15 = smov 0   ;;  %s1388_s16 = smov 0  }
   0xa   :  { %s1390_s17 = smov 0   ;;  %s1392_s18 = smov 0  }
   0xb   :  { %s1394_s19 = smov 0   ;;  %s1396_s20 = smov 0  }
   0xc LB: > { %1789 = sst [smem:[#allocation16_spill]] %s1347_s20  ;;  %s43_s21 = sadd.s32 1, %s1343_s19  ;;  %s1347_s20 = sphi %s1396_s20, %s24_s20   ;;  %s1343_s19 = sphi %s1394_s19, %s1826_s19   ;;  %s1339_s18 = sphi %s1392_s18, %s1825_s18   ;;  %s1335_s17 = sphi %s1390_s17, %s1824_s17   ;;  %s1331_s16 = sphi %s1388_s16, %s1823_s16   ;;  %s1327_s15 = sphi %s1386_s15, %s1822_s15  }
   0xd   : > { %s78_s22 = sadd.s32 1, %s1335_s17  ;;  %p45_p0 = scmp.ge.s32.totalorder %s43_s21, 2 }
   0xe   : > { %p1768_p1 = scmp.ne.s32.totalorder %s1335_s17, %s1331_s16  ;;  %p86_p2 = scmp.eq.s32.totalorder %s1347_s20, 0 }
   0xf   : > { %s1828_s21 = smov (%p45_p0, %s43_s21), 0  ;;  %p1047_p6 = scmp.lt.s32.totalorder %s1347_s20, 2 }
  0x10   : > { %1790 = sst [smem:[#allocation17_spill]] %s1828_s21  ;;  %p1426_p3 = por %p86_p2, %p1768_p1 }
  0x11   : > { %s75_s24 = ssub.s32 %s1343_s19, %s1828_s21  ;;  %s215_s25 = sand.u32 1, %s1347_s20  }
  0x12   : > { %p76_p5 = scmp.eq.s32.totalorder %s75_s24, 0  ;;  %s1769_s26 = sand.u32 1, %s1335_s17  }
  0x13   : > { %s1441_s28 = sshll.u32 %s1769_s26, 6  ;;  %s883_s29 = sshll.u32 %s1343_s19, 6 }
  0x14   : > { %s1437_s27 = scalar_select %p76_p5, %s1335_s17, %s78_s22  }
  0x15   : > { %s1793_s1 = sld [smem:[#allocation20_spill]]  ;;  %s219_s7 = scalar_lea.vmem [#allocation6], %s1441_s28 }
  0x16   : > { %1792 = sst [smem:[#allocation18_spill]] %s1437_s27  ;;  %s226_s8 = sshll.u32 %s219_s7, 4  ;;  %s1450_s8 = int_to_ptr.vmem [resolvable:$true] %s226_s8 }
  0x17   : > { %p1454_p7 = pnand %p1047_p6, %p1426_p3  ;;  %s1795_s2 = sld [smem:[#allocation21_spill]] }
  0x18   : > { %s1463_s13 = scalar_lea.sflag [#allocation7], %s215_s25 }
  0x19   : > { %s1794_s9 = scalar_select %p1454_p7, 1, 0 }
  0x1a   : > { %p1469_p9 = pneg %p1454_p7 }
  0x1b   : > { %s1447_s6 = scalar_lea.hbm %s1793_s1, %s883_s29  ;;  %s1144_s30 = scalar_lea.hbm %s1793_s1, 2048 }
  0x1c   : > { %s1139_s14 = scalar_lea.hbm %s1447_s6, 1024  ;;  %p1145_p12 = scmp.lt.u32.totalorder %s1447_s6, %s1793_s1 }
  0x1d   : > { %s1461_s12 = scalar_lea.hbm %s1795_s2, %s883_s29  ;;  %p1140_p8 = scmp.ne.s32.totalorder %s1447_s6, %s1139_s14 }
  0x1e   : > { %s1796_s22 = scalar_select %p1469_p9, 1, 0 }
  0x1f   : > { %p1142_p10 = pnand %p1469_p9, %p1140_p8  ;;  %p1146_p13 = scmp.lt.u32.totalorder %s1144_s30, %s1139_s14 }
  0x20   : > { %p1148_p2 = scmp.lt.u32.totalorder %s1139_s14, %s1447_s6 }
  0x21   : > { %p1143_p11 = pneg %p1142_p10  ;;  %p1147_p0 = por %p1146_p13, %p1145_p12 }
  0x23   : > { %p1149_p3 = por %p1148_p2, %p1147_p0 }
  0x25   : > { %p1150_p5 = pnand %p1149_p3, %p1143_p11 }
  0x27   : > { %1153 = shalt.err (!%p1150_p5)
}
  0x28   : > { %s1154_s25 = scalar_lea.vmem %s1450_s8, 1024  ;;  %s1349_s7 = smov [#allocation6]  }
  0x29   : > { %p1155_p6 = scmp.ne.s32.totalorder %s1450_s8, %s1154_s25  ;;  %s1159_s10 = sshll.u32 %s1349_s7, 4  ;;  %s1160_s10 = int_to_ptr.vmem [resolvable:$false] %s1159_s10 }
  0x2a   : > { %s1161_s11 = scalar_lea.vmem %s1160_s10, 2048  ;;  %p1162_p4 = scmp.lt.s32.totalorder %s1450_s8, %s1160_s10 }
  0x2b   : > { %p1157_p8 = pnand %p1155_p6, %p1469_p9  ;;  %p1163_p1 = scmp.lt.s32.totalorder %s1161_s11, %s1154_s25 }
  0x2d   : > { %p1158_p10 = pneg %p1157_p8  ;;  %p1164_p12 = por %p1163_p1, %p1162_p4 }
  0x2f   : > { %p1165_p13 = pnand %p1164_p12, %p1158_p10 }
  0x31   : > { %1168 = shalt.err (!%p1165_p13)
}
  0x32   : > { %s1770_s14 = smov 128   ;;  %s1771_s23 = smov 64  }
  0x33   : > { %s1773_s24 = smov 4   ;;  %s1497_s30 = sadd.s32 4294967295, %s1347_s20  }
  0x34   : > { %1035 = dma.hbm_to_vmem [thread:$0]  (!%p1454_p7), %s1447_s6, 1024, %s1450_s8, %s1463_s13, %s1770_s14, %s1771_s23, %s1773_s24  }
  0x35   : > { %s878_s5 = sadd.s32 4294967294, %s1347_s20   ;;  %p91_p1 = scmp.ne.s32.totalorder %s1331_s16, %s1327_s15 }
  0x36   : > { %p1777_p4 = scmp.eq.s32.totalorder %s1497_s30, 0  ;;  %p173_p11 = scmp.eq.s32.totalorder %s1497_s30, 1 }
  0x37   : > { %p179_p0 = scmp.eq.s32.totalorder %s878_s5, 1  ;;  %p879_p2 = scmp.ge.s32.totalorder %s1347_s20, 1 }
  0x38   : > { %p1507_p3 = por %p1777_p4, %p91_p1  ;;  %p1798_p5 = scmp.ne.s32.totalorder %s1335_s17, %s1331_s16 }
  0x39   : > { %p1518_p8 = por %p179_p0, %p91_p1  ;;  %p186_p10 = scmp.lt.s32.totalorder %s1347_s20, 3 }
  0x3a   : > { %s1797_s29 = scalar_select %p1507_p3, 1, 0 }
  0x3b   : > { %p1514_p6 = por %p173_p11, %p1798_p5  ;;  %p1523_p12 = pnand %p879_p2, %p186_p10 }
  0x3c   : > { %s1800_s8 = scalar_select %p1518_p8, 1, 0 }
  0x3d   : > { %s1799_s6 = scalar_select %p1514_p6, 1, 0 }
  0x3e   : > { %1801 = sst [smem:[#allocation19_spill]] %s1800_s8  ;;  %s1353_s7 = smov [#allocation3]  }
  0x3f   : > { %s1802_s25 = scalar_select %p1523_p12, 1, 0 }
  0x40   : > { %s201_s10 = sshll.u32 %s1353_s7, 4  ;;  %p1028_p13 = pneg %p1523_p12  ;;  %s1527_s10 = int_to_ptr.vmem [resolvable:$true] %s201_s10 }
  0x41   : > { %s240_s11 = scalar_lea.vmem [#allocation8], %s1441_s28  ;;  %s1169_s14 = scalar_lea.hbm %s1461_s12, 1024 }
  0x42   : > { %s247_s5 = sshll.u32 %s240_s11, 4  ;;  %p1536_p1 = pnand %p1028_p13, %p1777_p4  ;;  %s1532_s5 = int_to_ptr.vmem [resolvable:$true] %s247_s5 }
  0x43   : > { %p1170_p11 = scmp.ne.s32.totalorder %s1461_s12, %s1169_s14  ;;  %s1174_s24 = scalar_lea.hbm %s1795_s2, 2048 }
  0x44   : > { %s1803_s26 = scalar_select %p1536_p1, 1, 0 }
  0x45   : > { %p1172_p0 = pnand %p1170_p11, %p1469_p9  ;;  %p1175_p5 = scmp.lt.u32.totalorder %s1461_s12, %s1795_s2 }
  0x46   : > { %p1176_p10 = scmp.lt.u32.totalorder %s1174_s24, %s1169_s14  ;;  %p1178_p6 = scmp.lt.u32.totalorder %s1169_s14, %s1461_s12 }
  0x47   : > { %p1173_p2 = pneg %p1172_p0 }
  0x48   : > { %p1177_p8 = por %p1176_p10, %p1175_p5 }
  0x4a   : > { %p1179_p13 = por %p1178_p6, %p1177_p8 }
  0x4c   : > { %p1180_p4 = pnand %p1179_p13, %p1173_p2 }
  0x4e   : > { %1183 = shalt.err (!%p1180_p4)
}
  0x4f   : > { %s1184_s11 = scalar_lea.vmem %s1532_s5, 1024  ;;  %s1354_s23 = smov [#allocation8]  }
  0x50   : > { %p1185_p11 = scmp.ne.s32.totalorder %s1532_s5, %s1184_s11  ;;  %s1189_s7 = sshll.u32 %s1354_s23, 4  ;;  %s1190_s7 = int_to_ptr.vmem [resolvable:$false] %s1189_s7 }
  0x51   : > { %s1191_s1 = scalar_lea.vmem %s1190_s7, 2048  ;;  %p1192_p12 = scmp.lt.s32.totalorder %s1532_s5, %s1190_s7 }
  0x52   : > { %p1187_p0 = pnand %p1185_p11, %p1469_p9  ;;  %p1193_p1 = scmp.lt.s32.totalorder %s1191_s1, %s1184_s11 }
  0x54   : > { %p1188_p3 = pneg %p1187_p0  ;;  %p1194_p5 = por %p1193_p1, %p1192_p12 }
  0x56   : > { %p1195_p10 = pnand %p1194_p5, %p1188_p3 }
  0x58   : > { %1198 = shalt.err (!%p1195_p10)
}
  0x59   : > { %s1804_s21 = smov 4   ;;  %s1805_s14 = smov 64  }
  0x5a   : > { %s1806_s24 = smov 128   ;;  %s927_s2 = sshll.u32 %s1343_s19, 10 }
  0x5b   : > { %1038 = dma.hbm_to_vmem [thread:$0]  (!%p1454_p7), %s1461_s12, 1024, %s1532_s5, %s1463_s13, %s1806_s24, %s1805_s14, %s1804_s21  }
  0x5c   : > { %s1199_s7 = scalar_lea.hbm %s1763_s0, 128  ;;  %p1807_p3 = scmp.ne.s32.totalorder %s1803_s26, 0 }
  0x5d   : > { %p1200_p4 = scmp.ne.s32.totalorder %s1763_s0, %s1199_s7  ;;  %p1206_p1 = scmp.lt.u32.totalorder %s1199_s7, %s1763_s0 }
  0x5e   : > { %p1201_p6 = pneg %p1807_p3 }
  0x60   : > { %p1202_p8 = pnand %p1201_p6, %p1200_p4 }
  0x62   : > { %p1203_p12 = pneg %p1202_p8 }
  0x64   : > { %p1208_p2 = pnand %p1206_p1, %p1203_p12 }
  0x66   : > { %1211 = shalt.err (!%p1208_p2)
}
  0x67   : > { %s1212_s12 = scalar_lea.vmem %s1527_s10, 128  ;;  %p1220_p5 = scmp.lt.s32.totalorder %s1527_s10, %s1527_s10 }
  0x68   : > { %p1213_p13 = scmp.ne.s32.totalorder %s1527_s10, %s1212_s12  ;;  %p1221_p10 = scmp.lt.s32.totalorder %s1212_s12, %s1212_s12 }
  0x6a   : > { %p1215_p11 = pnand %p1213_p13, %p1201_p6  ;;  %p1222_p7 = por %p1221_p10, %p1220_p5 }
  0x6c   : > { %p1216_p0 = pneg %p1215_p11 }
  0x6e   : > { %p1223_p9 = pnand %p1222_p7, %p1216_p0 }
  0x70   : > { %1226 = shalt.err (!%p1223_p9)
}
  0x71   : > { %1031 = dma.hbm_to_vmem [thread:$0]  (!%p1807_p3), %s1763_s0, 128, %s1527_s10, [#allocation4], %s1805_s14, %s1805_s14, %s1804_s21  }
  0x72   : > { %s1593_s5 = scalar_lea.hbm %s1766_s3, %s927_s2  ;;  %s261_s26 = scalar_lea.vmem [#allocation9], %s1441_s28 }
  0x73   : > { %s269_s24 = sshll.u32 %s261_s26, 4  ;;  %s1808_s23 = sand.u32 1, %s1335_s17   ;;  %s1596_s24 = int_to_ptr.vmem [resolvable:$true] %s269_s24 }
  0x74   : > { %s1600_s7 = scalar_lea.sflag [#allocation10], %s1808_s23  ;;  %s1227_s11 = scalar_lea.hbm %s1593_s5, 1024 }
  0x75   : > { %p1228_p7 = scmp.ne.s32.totalorder %s1593_s5, %s1227_s11  ;;  %p1809_p9 = scmp.ne.s32.totalorder %s1796_s22, 0 }
  0x76   : > { %s1232_s2 = scalar_lea.hbm %s1766_s3, 2048  ;;  %p1233_p6 = scmp.lt.u32.totalorder %s1593_s5, %s1766_s3 }
  0x77   : > { %p1230_p4 = pnand %p1228_p7, %p1809_p9  ;;  %p1234_p8 = scmp.lt.u32.totalorder %s1232_s2, %s1227_s11 }
  0x78   : > { %p1236_p1 = scmp.lt.u32.totalorder %s1227_s11, %s1593_s5 }
  0x79   : > { %p1231_p3 = pneg %p1230_p4  ;;  %p1235_p12 = por %p1234_p8, %p1233_p6 }
  0x7b   : > { %p1237_p2 = por %p1236_p1, %p1235_p12 }
  0x7d   : > { %p1238_p13 = pnand %p1237_p2, %p1231_p3 }
  0x7f   : > { %1241 = shalt.err (!%p1238_p13)
}
  0x80   : > { %s1242_s28 = scalar_lea.vmem %s1596_s24, 1024  ;;  %s1355_s27 = smov [#allocation9]  }
  0x81   : > { %p1243_p11 = scmp.ne.s32.totalorder %s1596_s24, %s1242_s28  ;;  %s1247_s13 = sshll.u32 %s1355_s27, 4  ;;  %s1248_s13 = int_to_ptr.vmem [resolvable:$false] %s1247_s13 }
  0x82   : > { %s1249_s8 = scalar_lea.vmem %s1248_s13, 2048  ;;  %p1250_p10 = scmp.lt.s32.totalorder %s1596_s24, %s1248_s13 }
  0x83   : > { %p1245_p0 = pnand %p1243_p11, %p1809_p9  ;;  %p1251_p7 = scmp.lt.s32.totalorder %s1249_s8, %s1242_s28 }
  0x85   : > { %p1246_p5 = pneg %p1245_p0  ;;  %p1252_p4 = por %p1251_p7, %p1250_p10 }
  0x87   : > { %p1253_p6 = pnand %p1252_p4, %p1246_p5 }
  0x89   : > { %1256 = shalt.err (!%p1253_p6)
}
  0x8a   : > { %p1810_p3 = scmp.ne.s32.totalorder %s1794_s9, 0  ;;  %p1811_p9 = scmp.ne.s32.totalorder %s1802_s25, 0 }
  0x8b   : > { %p1812_p8 = scmp.eq.s32.totalorder (!%p1811_p9), %s1497_s30, 0 }
  0x8c   : > { %1041 = dma.hbm_to_vmem [thread:$0]  (!%p1810_p3), %s1593_s5, 1024, %s1596_s24, %s1600_s7, %s1805_s14, %s1805_s14, %s1804_s21  }
  0x8d   : > { %281 = sbr.rel (%p1811_p9) target bundleno = 666 (0x29a), region = 36 }
  0x94   : > { %1310 = dma.done.wait (%p1812_p8), [#allocation4], 128   ;;  %p1813_p12 = pmov %p1812_p8 }
  0x95   : > { %s287_s9 = sand.u32 1, %s1497_s30   ;;  %s1635_s22 = sand.u32 1, %s1331_s16  }
  0x96   : > { %1312 = vsyncadd (%p1813_p12), [#allocation4], 4294967168  ;;  %s891_s26 = sshll.u32 %s1635_s22, 6  ;;  %s288_s23 = scalar_lea.sflag [#allocation7], %s287_s9 }
  0x97   : > { %s1638_s11 = scalar_lea.vmem [#allocation6], %s891_s26  ;;  %p1814_p1 = scmp.ne.s32.totalorder %s1797_s29, 0 }
  0x99   : > { %1314 = dma.done.wait (%p1814_p1), %s288_s23, 2048  }
  0x9a   : > { %1316 = vsyncadd (%p1814_p1), %s288_s23, 4294965248  ;;  %s1644_s25 = scalar_lea.vmem [#allocation8], %s891_s26  ;;  %s306_s21 = scalar_lea.sflag [#allocation10], %s1635_s22 }
  0x9b   : > { %s1647_s14 = scalar_lea.vmem [#allocation9], %s891_s26 }
  0x9c   : > { %1318 = dma.done.wait (%p1814_p1), %s306_s21, 1024  }
  0x9d   : > { %1320 = vsyncadd (%p1814_p1), %s306_s21, 4294966272  ;;  %v1356_v0 = vmov 0.0   ;;  %vm1357_vm0 = vmmov 0   ;;  %v1106_v1 = vld [vmem:[%s1638_s11] sm:$0xff]   ;;  %v1107_v2 = vld [vmem:[%s1638_s11 + $0x8] sm:$0xff]   ;;  %s894_s30 = sshll.u32 %s1635_s22, 4 }
  0x9e   : > { %956 = vmatprep.subr.bf16.mxu0 %v1356_v0  ;;  %976 = vmatprep.subr.bf16.mxu1 %v1356_v0  ;;  %v1108_v3 = vld [vmem:[%s1638_s11 + $0x10] sm:$0xff]   ;;  %v1113_v4 = vld [vmem:[%s1644_s25] sm:$0xff]   ;;  %v1115_v5 = vld [vmem:[%s1644_s25 + $0x8] sm:$0xff]   ;;  %s343_s29 = scalar_lea.vmem [#allocation11], %s894_s30  ;;  %s928_s24 = sshll.u32 %s1339_s18, 8 }
  0x9f   : > { %972 = vmatprep.mubr.msk.bf16.mxu0 %vm1357_vm0, %v1356_v0  ;;  %992 = vmatprep.mubr.msk.bf16.mxu1 %vm1357_vm0, %v1356_v0  ;;  %v1109_v6 = vld [vmem:[%s1638_s11 + $0x18] sm:$0xff]   ;;  %v1117_v7 = vld [vmem:[%s1644_s25 + $0x10] sm:$0xff]   ;;  %v1110_v8 = vld [vmem:[%s1638_s11 + $0x20] sm:$0xff]   ;;  %s730_s5 = sshll.u32 %s343_s29, 4  ;;  %s1714_s1 = scalar_lea.hbm %s1767_s4, %s928_s24  ;;  %s1709_s5 = int_to_ptr.vmem [resolvable:$true] %s730_s5 }
  0xa0   : > { %957 = vmatpush3.bf16.msra.mxu0 %v1106_v1  ;;  %977 = vmatpush3.bf16.msra.mxu1 %v1113_v4  ;;  %v1111_v9 = vld [vmem:[%s1638_s11 + $0x28] sm:$0xff]   ;;  %v1118_v10 = vld [vmem:[%s1644_s25 + $0x18] sm:$0xff]   ;;  %v1119_v11 = vld [vmem:[%s1644_s25 + $0x20] sm:$0xff]   ;;  %s715_s2 = scalar_lea.sflag [#allocation5], %s1635_s22  ;;  %s1257_s12 = scalar_lea.vmem %s1709_s5, 256 }
  0xa1   : > { %958 = vmatprep.subr.bf16.mxu0 %v1356_v0  ;;  %978 = vmatprep.subr.bf16.mxu1 %v1356_v0  ;;  %v1112_v12 = vld [vmem:[%s1638_s11 + $0x30] sm:$0xff]   ;;  %v1120_v13 = vld [vmem:[%s1644_s25 + $0x28] sm:$0xff]   ;;  %v1114_v14 = vld [vmem:[%s1638_s11 + $0x38] sm:$0xff]   ;;  %p1258_p2 = scmp.ne.s32.totalorder %s1709_s5, %s1257_s12  ;;  %p1815_p13 = scmp.ne.s32.totalorder %s1799_s6, 0 }
  0xa2   : > { %v1116_v15 = vld [vmem:[#allocation3] sm:$0xff]   ;;  %v1121_v16 = vld [vmem:[%s1644_s25 + $0x30] sm:$0xff]   ;;  %v1123_v18 = vld [vmem:[%s1647_s14] sm:$0xff]   ;;  %s1358_s18 = smov [#allocation11]  }
  0xa3   : > { %v1122_v17 = vld [vmem:[%s1644_s25 + $0x38] sm:$0xff]   ;;  %v1124_v19 = vld [vmem:[%s1647_s14 + $0x8] sm:$0xff]   ;;  %v1125_v20 = vld [vmem:[%s1647_s14 + $0x10] sm:$0xff]   ;;  %p1259_p11 = pnand %p1258_p2, %p1815_p13  ;;  %s1261_s20 = sshll.u32 %s1358_s18, 4  ;;  %s1262_s20 = int_to_ptr.vmem [resolvable:$false] %s1261_s20 }
  0xa4   : > { %959 = vmatpush3.bf16.msra.mxu0 %v1107_v2  ;;  %979 = vmatpush3.bf16.msra.mxu1 %v1115_v5  ;;  %v1126_v21 = vld [vmem:[%s1647_s14 + $0x18] sm:$0xff]   ;;  %v1127_v22 = vld [vmem:[%s1647_s14 + $0x20] sm:$0xff]   ;;  %v1128_v23 = vld [vmem:[%s1647_s14 + $0x28] sm:$0xff]   ;;  %s1263_s28 = scalar_lea.vmem %s1262_s20, 512  ;;  %p1264_p5 = scmp.lt.s32.totalorder %s1709_s5, %s1262_s20 }
  0xa5   : > { %960 = vmatprep.subr.bf16.mxu0 %v1356_v0  ;;  %980 = vmatprep.subr.bf16.mxu1 %v1356_v0  ;;  %v1129_v24 = vld [vmem:[%s1647_s14 + $0x30] sm:$0xff]   ;;  %v1130_v25 = vld [vmem:[%s1647_s14 + $0x38] sm:$0xff]   ;;  %p1260_p0 = pneg %p1259_p11  ;;  %p1265_p10 = scmp.lt.s32.totalorder %s1263_s28, %s1257_s12 }
  0xa7   : > { %p1266_p7 = por %p1265_p10, %p1264_p5 }
  0xa8   : > { %961 = vmatpush3.bf16.msra.mxu0 %v1108_v3  ;;  %981 = vmatpush3.bf16.msra.mxu1 %v1117_v7 }
  0xa9   : > { %962 = vmatprep.subr.bf16.mxu0 %v1356_v0  ;;  %982 = vmatprep.subr.bf16.mxu1 %v1356_v0  ;;  %p1267_p4 = pnand %p1266_p7, %p1260_p0 }
  0xac   : > { %963 = vmatpush3.bf16.msra.mxu0 %v1109_v6  ;;  %983 = vmatpush3.bf16.msra.mxu1 %v1118_v10 }
  0xad   : > { %964 = vmatprep.subr.bf16.mxu0 %v1356_v0  ;;  %984 = vmatprep.subr.bf16.mxu1 %v1356_v0 }
  0xb0   : > { %965 = vmatpush3.bf16.msra.mxu0 %v1110_v8  ;;  %985 = vmatpush3.bf16.msra.mxu1 %v1119_v11 }
  0xb1   : > { %966 = vmatprep.subr.bf16.mxu0 %v1356_v0  ;;  %986 = vmatprep.subr.bf16.mxu1 %v1356_v0 }
  0xb4   : > { %967 = vmatpush3.bf16.msra.mxu0 %v1111_v9  ;;  %987 = vmatpush3.bf16.msra.mxu1 %v1120_v13 }
  0xb5   : > { %968 = vmatprep.subr.bf16.mxu0 %v1356_v0  ;;  %988 = vmatprep.subr.bf16.mxu1 %v1356_v0 }
  0xb8   : > { %969 = vmatpush3.bf16.msra.mxu0 %v1112_v12  ;;  %989 = vmatpush3.bf16.msra.mxu1 %v1121_v16 }
  0xb9   : > { %970 = vmatprep.subr.bf16.mxu0 %v1356_v0  ;;  %990 = vmatprep.subr.bf16.mxu1 %v1356_v0 }
  0xbc   : > { %971 = vmatpush3.bf16.msra.mxu0 %v1114_v14  ;;  %991 = vmatpush3.bf16.msra.mxu1 %v1122_v17 }
  0xbd   : > { %996 = vmatprep.subr.bf16.mxu0 %v1356_v0 }
  0xbf   : > { %973 = vmatmul.mubr.bf16.vlgmr.msra.gmra.mrb[0].mxu0 %v1116_v15  ;;  %993 = vmatmul.mubr.bf16.vlgmr.msra.gmra.mrb[0].mxu1 %v1116_v15 }
  0xc0   : > { %1012 = vmatprep.mubr.msk.bf16.mxu0 %vm1357_vm0, %v1356_v0  ;;  %997 = vmatpush3.bf16.msra.mxu0 %v1123_v18 }
  0xc1   : > { %998 = vmatprep.subr.bf16.mxu0 %v1356_v0 }
  0xc4   : > { %999 = vmatpush3.bf16.msra.mxu0 %v1124_v19 }
  0xc5   : > { %1000 = vmatprep.subr.bf16.mxu0 %v1356_v0 }
  0xc8   : > { %1001 = vmatpush3.bf16.msra.mxu0 %v1125_v20 }
  0xc9   : > { %1002 = vmatprep.subr.bf16.mxu0 %v1356_v0 }
  0xcc   : > { %1003 = vmatpush3.bf16.msra.mxu0 %v1126_v21 }
  0xcd   : > { %1004 = vmatprep.subr.bf16.mxu0 %v1356_v0 }
  0xd0   : > { %1005 = vmatpush3.bf16.msra.mxu0 %v1127_v22 }
  0xd1   : > { %1006 = vmatprep.subr.bf16.mxu0 %v1356_v0 }
  0xd4   : > { %1007 = vmatpush3.bf16.msra.mxu0 %v1128_v23 }
  0xd5   : > { %1008 = vmatprep.subr.bf16.mxu0 %v1356_v0 }
  0xd8   : > { %1009 = vmatpush3.bf16.msra.mxu0 %v1129_v24 }
  0xd9   : > { %1010 = vmatprep.subr.bf16.mxu0 %v1356_v0 }
  0xdc   : > { %1011 = vmatpush3.bf16.msra.mxu0 %v1130_v25 }
 0x192   : > { %v457_v26 = vpop.f32.mrb[0].mxu0  ;;  %v562_v32 = vpop.f32.mrb[0].mxu1 }
 0x193   : > { %v912_v27 = vmul.f32 -1.442695, %v457_v26  ;;  %v974_v28 = vpop.f32.mrb[1].mxu0  ;;  %v994_v33 = vpop.f32.mrb[1].mxu1 }
 0x194   : > { %v460_v29 = vpop.f32.mrb[2].mxu0  ;;  %v565_v34 = vpop.f32.mrb[2].mxu1 }
 0x195   : > { %1131 = vpow2.f32 %v912_v27  ;;  %v913_v30 = vmul.f32 -1.442695, %v460_v29  ;;  %v975_v31 = vpop.f32.mrb[3].mxu0  ;;  %v995_v35 = vpop.f32.mrb[3].mxu1 }
 0x197   : > { %1133 = vpow2.f32 %v913_v30 }
 0x19f   : > { %v1132_v36 = vpop.eup %1131 }
 0x1a0   : > { %v575_v37 = vadd.f32 1.0, %v1132_v36 }
 0x1a1   : > { %v1134_v38 = vpop.eup %1133 }
 0x1a2   : > { %1135 = vrcp.f32 %v575_v37  ;;  %v576_v39 = vadd.f32 1.0, %v1134_v38 }
 0x1a4   : > { %1137 = vrcp.f32 %v576_v39 }
 0x1ac   : > { %v1136_v40 = vpop.eup %1135 }
 0x1ad   : > { %v581_v41 = vmul.f32 %v1136_v40, %v457_v26 }
 0x1ae   : > { %v1138_v42 = vpop.eup %1137 }
 0x1af   : > { %v582_v43 = vmul.f32 %v1138_v42, %v460_v29  ;;  %v583_v44 = vmul.f32 %v581_v41, %v562_v32 }
 0x1b1   : > { %v584_v45 = vmul.f32 %v582_v43, %v565_v34 }
 0x1b3   : > { %v585_v46 = vpack.c.bf16 %v584_v45, %v583_v44 }
 0x1b5   : > { %1013 = vmatmul.mubr.bf16.vlgmr.msra.gmra.mrb[4].mxu0 %v585_v46 }
 0x288   : > { %v684_v47 = vpop.f32.mrb[4].mxu0 }
 0x289   : > { %712 = vst [vmem:[%s343_s29] sm:$0xff] %v684_v47  ;;  %v1014_v48 = vpop.f32.mrb[5].mxu0 }
 0x28a   : > { %v687_v49 = vpop.f32.mrb[6].mxu0 }
 0x28b   : > { %713 = vst [vmem:[%s343_s29 + $0x8] sm:$0xff] %v687_v49  ;;  %v1015_v50 = vpop.f32.mrb[7].mxu0 }
 0x28c   : > { %1270 = shalt.err (!%p1267_p4)
}
 0x28d   : > { %s1271_s27 = scalar_lea.hbm %s1714_s1, 256  ;;  %s1275_s9 = scalar_lea.hbm %s1767_s4, 512 }
 0x28e   : > { %p1272_p6 = scmp.ne.s32.totalorder %s1714_s1, %s1271_s27  ;;  %p1276_p8 = scmp.lt.u32.totalorder %s1714_s1, %s1767_s4 }
 0x28f   : > { %p1277_p12 = scmp.lt.u32.totalorder %s1275_s9, %s1271_s27  ;;  %p1279_p2 = scmp.lt.u32.totalorder %s1271_s27, %s1714_s1 }
 0x290   : > { %p1273_p3 = pnand %p1272_p6, %p1815_p13 }
 0x291   : > { %p1278_p1 = por %p1277_p12, %p1276_p8 }
 0x292   : > { %p1274_p9 = pneg %p1273_p3 }
 0x293   : > { %p1280_p11 = por %p1279_p2, %p1278_p1 }
 0x295   : > { %p1281_p0 = pnand %p1280_p11, %p1274_p9 }
 0x297   : > { %1284 = shalt.err (!%p1281_p0)
}
 0x298   : > { %s1359_s11 = smov 128   ;;  %s1360_s25 = smov 8  }
 0x299   : > { %1026 = dma.vmem_to_hbm [thread:$0]  (%p1815_p13), %s1709_s5, 256, %s1714_s1, %s715_s2, %s1359_s11, %s1359_s11, %s1360_s25  }
 0x29a PF: > { %s1816_s21 = sld [smem:[#allocation19_spill]]  ;;  %s1817_s14 = sld [smem:[#allocation16_spill]] }
 0x29b   : > { %s745_s30 = sand.u32 1, %s1327_s15  }
 0x29c   : > { %s746_s29 = scalar_lea.sflag [#allocation5], %s745_s30 }
 0x2a0   : > { %p1818_p5 = scmp.ne.s32.totalorder %s1816_s21, 0  ;;  %p1819_p10 = scmp.ge.s32.totalorder %s1817_s14, 2 }
 0x2a2   : > { %p1043_p7 = pnand %p1819_p10, %p1818_p5 }
 0x2a4   : > { %1322 = dma.done.wait (!%p1043_p7), %s746_s29, 256  }
 0x2a5   : > { %1324 = vsyncadd (!%p1043_p7), %s746_s29, 4294967040  ;;  %s24_s20 = sadd.s32 1, %s1817_s14   ;;  %s1820_s24 = sld [smem:[#allocation18_spill]] }
 0x2a6   : > { %p21_p4 = scmp.ge.s32.totalorder %s24_s20, 4   ;;  %s1821_s6 = sld [smem:[#allocation17_spill]] }
 0x2a7   : > { %s1822_s15 = smov %s1331_s16  ;;  %s1823_s16 = smov %s1335_s17 }
 0x2a8   : > { %s1825_s18 = smov %s1343_s19  ;;  %23 = sbr.rel (!%p21_p4) target bundleno = 12 (0xc), region = 123 }
 0x2ab   : > { %s1824_s17 = smov %s1820_s24 }
 0x2ac   : > { %s1826_s19 = smov %s1821_s6 }
 0x2af   :  { %751 = vsyncpa [#allocation4], 1 }
 0x2b0   :  { %753 = vsyncpa [#allocation4 + $0x1], 1 }
 0x2b1   :  { %754 = vsyncpa [#allocation7], 1 }
 0x2b2   :  { %756 = vsyncpa [#allocation7 + $0x1], 1 }
 0x2b3   :  { %757 = vsyncpa [#allocation10], 1 }
 0x2b4   :  { %759 = vsyncpa [#allocation10 + $0x1], 1 }
 0x2b5   :  { %760 = vsyncpa [#allocation5], 1 }
 0x2b6   :  { %762 = vsyncpa [#allocation5 + $0x1], 1 }

</bundles_post_ra>
